<compile_context>
chip_gen: v7x
topology: tpu7x:2x2x1
jax: 0.10.0
libtpu: 0.0.40
codegen_flags: <defaults>
</compile_context>

<pallas_src>
import functools

import jax
import jax.numpy as jnp
from jax.experimental import pallas as pl
from jax.experimental.pallas import tpu as pltpu


def _ce_kernel(logits_ref, tgt_ref, loss_ref, cnt_ref, *,
               tk, n_pixels, num_classes, need_mask):
    j = pl.program_id(1)

    @pl.when(j == 0)
    def _():
        loss_ref[...] = jnp.zeros_like(loss_ref)
        cnt_ref[...] = jnp.zeros_like(cnt_ref)

    x = logits_ref[...].astype(jnp.float32)     # (1, C, TK)
    t = tgt_ref[...]                            # (1, 1, TK) int32

    # Numerically stable log-sum-exp over the class (sublane) axis.
    mx = jnp.max(x, axis=1, keepdims=True)                               # (1, 1, TK)
    lse = mx + jnp.log(jnp.sum(jnp.exp(x - mx), axis=1, keepdims=True))  # (1, 1, TK)

    # One-hot of targets from a sublane class iota (no gather needed).
    cls = jax.lax.broadcasted_iota(jnp.int32, (1, num_classes, tk), 1)   # (1, C, TK)
    onehot = cls == t                                                    # (1, C, TK) bool

    if need_mask:
        # Last tile may run past N: block padding holds unspecified data, so
        # zero the one-hot on out-of-bounds lanes and kill any NaN/Inf in nll.
        pix = j * tk + jax.lax.broadcasted_iota(jnp.int32, (1, 1, tk), 2)
        valid = pix < n_pixels                                           # (1, 1, TK)
        onehot = jnp.logical_and(onehot, valid)

    oh = onehot.astype(jnp.float32)                                      # (1, C, TK)
    tgt_logit = jnp.sum(x * oh, axis=1, keepdims=True)                   # (1, 1, TK)
    nll = lse - tgt_logit                                                # (1, 1, TK)
    if need_mask:
        nll = jnp.where(valid, nll, 0.0)

    # Per-class partial loss sums / pixel counts (XLU lane reduces), accumulated
    # in the resident output block across the pixel-tile axis.
    loss_ref[...] += jnp.sum(oh * nll, axis=2, keepdims=True)            # (1, C, 1)
    cnt_ref[...] += jnp.sum(oh, axis=2, keepdims=True)                   # (1, C, 1)


class MutilCrossEntropyLoss:
    """JAX/Pallas port of the PyTorch module (alpha is stored but unused, as in torch)."""

    def __init__(self, alpha):
        self.alpha = alpha  # kept for parity with the PyTorch __init__; not used in forward

    def __call__(self, y_pred_logits, y_true):
        B, C = y_pred_logits.shape[0], y_pred_logits.shape[1]

        # Native NCHW layout: pixels on lanes, classes on sublanes.  No transpose,
        # no f32 upcast, no HBM padding.
        logits = y_pred_logits.reshape(B, C, -1)              # (B, C, N), native dtype
        N = logits.shape[-1]
        targets = y_true.astype(jnp.int32).reshape(B, 1, N)   # (B, 1, N)

        # Pixel tile: ~1 MiB of logits per grid step (lane axis, multiple of 128).
        itemsize = jnp.dtype(logits.dtype).itemsize
        tk = (1 << 20) // max(C * itemsize, 1)
        tk = max(128, min(tk, 32768))
        tk = (tk // 128) * 128
        if tk >= N:
            tk = N                      # full-dim block (always legal)
        num_tiles = pl.cdiv(N, tk)
        need_mask = (N % tk) != 0

        kernel = functools.partial(
            _ce_kernel, tk=tk, n_pixels=N, num_classes=C, need_mask=need_mask)

        loss_part, cnt_part = pl.pallas_call(
            kernel,
            out_shape=(
                jax.ShapeDtypeStruct((B, C, 1), jnp.float32),
                jax.ShapeDtypeStruct((B, C, 1), jnp.float32),
            ),
            grid_spec=pltpu.PrefetchScalarGridSpec(
                num_scalar_prefetch=0,
                grid=(B, num_tiles),
                in_specs=[
                    pl.BlockSpec((1, C, tk), lambda b, j: (b, 0, j)),
                    pl.BlockSpec((1, 1, tk), lambda b, j: (b, 0, j)),
                ],
                out_specs=[
                    pl.BlockSpec((1, C, 1), lambda b, j: (b, 0, 0)),
                    pl.BlockSpec((1, C, 1), lambda b, j: (b, 0, 0)),
                ],
            ),
            compiler_params=pltpu.CompilerParams(
                dimension_semantics=("parallel", "arbitrary"),
                vmem_limit_bytes=32 * 1024 * 1024,
            ),
        )(logits, targets)

        # Tiny glue: combine per-batch partials, build the class-presence mask,
        # and apply the weighted-mean reduction of F.cross_entropy(weight=mask).
        loss_c = jnp.sum(loss_part[:, :, 0], axis=0)   # (C,)
        cnt_c = jnp.sum(cnt_part[:, :, 0], axis=0)     # (C,)
        mask = (cnt_c > 0).astype(jnp.float32)
        num = jnp.sum(mask * loss_c)
        den = jnp.sum(mask * cnt_c)
        return num / den


def _reference(y_pred_logits, y_true):
    B, C = y_pred_logits.shape[0], y_pred_logits.shape[1]
    logits = y_pred_logits.astype(jnp.float32).reshape(B, C, -1)
    t = y_true.astype(jnp.int32).reshape(B, -1)
    onehot = jax.nn.one_hot(t, C, axis=-1)                         # (B, N, C)
    mask = (jnp.sum(onehot, axis=(0, 1)) > 0).astype(jnp.float32)  # (C,)
    logp = jax.nn.log_softmax(logits, axis=1)                      # (B, C, N)
    nll = -jnp.take_along_axis(logp, t[:, None, :], axis=1)[:, 0, :]  # (B, N)
    w = mask[t]                                                    # (B, N)
    return jnp.sum(w * nll) / jnp.sum(w)


if __name__ == "__main__":
    key = jax.random.PRNGKey(0)
    k1, k2 = jax.random.split(key)

    B, C, H, W = 2, 4, 16, 16
    y_pred_logits = jax.random.normal(k1, (B, C, H, W), dtype=jnp.float32)
    y_true = jax.random.randint(k2, (B, H, W), 0, C, dtype=jnp.int32)

    alpha = jnp.ones((C,), dtype=jnp.float32)  # deterministic init; unused in forward (as in torch)
    loss_fn = MutilCrossEntropyLoss(alpha)

    loss = jax.block_until_ready(loss_fn(y_pred_logits, y_true))
    ref = jax.block_until_ready(_reference(y_pred_logits, y_true))

    assert jnp.allclose(loss, ref, rtol=1e-5, atol=1e-5), (loss, ref)
    print("KERNEL_OK")
</pallas_src>

<mosaic_0001>
module attributes {stable_mosaic.version = 11 : i64} {
  func.func @_ce_kernel(%arg0: i32, %arg1: i32, %arg2: memref<1x4x256xf32, #tpu.memory_space<vmem>>, %arg3: memref<1x1x256xi32, #tpu.memory_space<vmem>>, %arg4: memref<1x4x1xf32, #tpu.memory_space<vmem>>, %arg5: memref<1x4x1xf32, #tpu.memory_space<vmem>>) attributes {dimension_semantics = [#tpu.dimension_semantics<parallel>, #tpu.dimension_semantics<arbitrary>], iteration_bounds = array<i64: 2, 1>, scalar_prefetch = 0 : i64, scratch_operands = 0 : i64, tpu.core_type = #tpu.core_type<tc>, window_params = [{transform_indices = @transform_0, window_bounds = array<i64: 1, 4, 256>}, {transform_indices = @transform_1, window_bounds = array<i64: 1, 1, 256>}, {transform_indices = @transform_2, window_bounds = array<i64: 1, 4, 1>}, {transform_indices = @transform_3, window_bounds = array<i64: 1, 4, 1>}]} {
    %c0_i32 = arith.constant 0 : i32
    %0 = arith.cmpi eq, %arg1, %c0_i32 : i32
    %1 = arith.extui %0 : i1 to i32
    %c0_i32_0 = arith.constant 0 : i32
    %2 = arith.cmpi ne, %1, %c0_i32_0 : i32
    scf.if %2 {
      %cst_22 = arith.constant 0.000000e+00 : f32
      %35 = vector.broadcast %cst_22 : f32 to vector<1x4x1xf32>
      %c0_23 = arith.constant 0 : index
      %c0_24 = arith.constant 0 : index
      %c0_25 = arith.constant 0 : index
      %36 = vector.load %arg4[%c0_23, %c0_24, %c0_25] : memref<1x4x1xf32, #tpu.memory_space<vmem>>, vector<1x4x1xf32>
      tpu.vector_store %arg4[%c0_23, %c0_24, %c0_25], %35 {strides = array<i32>} : memref<1x4x1xf32, #tpu.memory_space<vmem>>, vector<1x4x1xf32>,
      %cst_26 = arith.constant 0.000000e+00 : f32
      %37 = vector.broadcast %cst_26 : f32 to vector<1x4x1xf32>
      %c0_27 = arith.constant 0 : index
      %c0_28 = arith.constant 0 : index
      %c0_29 = arith.constant 0 : index
      %38 = vector.load %arg5[%c0_27, %c0_28, %c0_29] : memref<1x4x1xf32, #tpu.memory_space<vmem>>, vector<1x4x1xf32>
      tpu.vector_store %arg5[%c0_27, %c0_28, %c0_29], %37 {strides = array<i32>} : memref<1x4x1xf32, #tpu.memory_space<vmem>>, vector<1x4x1xf32>,
    } else {
    }
    %c0 = arith.constant 0 : index
    %c0_1 = arith.constant 0 : index
    %c0_2 = arith.constant 0 : index
    %3 = vector.load %arg2[%c0, %c0_1, %c0_2] : memref<1x4x256xf32, #tpu.memory_space<vmem>>, vector<1x4x256xf32>
    %c0_3 = arith.constant 0 : index
    %c0_4 = arith.constant 0 : index
    %c0_5 = arith.constant 0 : index
    %4 = vector.load %arg3[%c0_3, %c0_4, %c0_5] : memref<1x1x256xi32, #tpu.memory_space<vmem>>, vector<1x1x256xi32>
    %cst = arith.constant dense<0xFF800000> : vector<1x256xf32>
    %5 = vector.multi_reduction <maximumf>, %3, %cst [1] : vector<1x4x256xf32> to vector<1x256xf32>
    %6 = vector.shape_cast %5 : vector<1x256xf32> to vector<1x1x256xf32>
    %7 = vector.broadcast %6 : vector<1x1x256xf32> to vector<1x4x256xf32>
    %8 = arith.subf %3, %7 : vector<1x4x256xf32>
    %9 = math.exp %8 : vector<1x4x256xf32>
    %cst_6 = arith.constant dense<0.000000e+00> : vector<1x256xf32>
    %10 = vector.multi_reduction <add>, %9, %cst_6 [1] : vector<1x4x256xf32> to vector<1x256xf32>
    %11 = vector.shape_cast %10 : vector<1x256xf32> to vector<1x1x256xf32>
    %12 = math.log %11 : vector<1x1x256xf32>
    %13 = arith.addf %6, %12 : vector<1x1x256xf32>
    %14 = tpu.iota {dimensions = array<i32: 1>} : vector<1x4x256xi32>
    %15 = vector.broadcast %4 : vector<1x1x256xi32> to vector<1x4x256xi32>
    %16 = arith.cmpi eq, %14, %15 : vector<1x4x256xi32>
    %17 = arith.extui %16 : vector<1x4x256xi1> to vector<1x4x256xi32>
    %18 = arith.sitofp %17 : vector<1x4x256xi32> to vector<1x4x256xf32>
    %19 = arith.mulf %3, %18 : vector<1x4x256xf32>
    %cst_7 = arith.constant dense<0.000000e+00> : vector<1x256xf32>
    %20 = vector.multi_reduction <add>, %19, %cst_7 [1] : vector<1x4x256xf32> to vector<1x256xf32>
    %21 = vector.shape_cast %20 : vector<1x256xf32> to vector<1x1x256xf32>
    %22 = arith.subf %13, %21 : vector<1x1x256xf32>
    %c0_8 = arith.constant 0 : index
    %c0_9 = arith.constant 0 : index
    %c0_10 = arith.constant 0 : index
    %23 = vector.load %arg4[%c0_8, %c0_9, %c0_10] : memref<1x4x1xf32, #tpu.memory_space<vmem>>, vector<1x4x1xf32>
    %24 = vector.broadcast %22 : vector<1x1x256xf32> to vector<1x4x256xf32>
    %25 = arith.mulf %18, %24 : vector<1x4x256xf32>
    %cst_11 = arith.constant dense<0.000000e+00> : vector<1x4xf32>
    %26 = vector.multi_reduction <add>, %25, %cst_11 [2] : vector<1x4x256xf32> to vector<1x4xf32>
    %27 = vector.shape_cast %26 : vector<1x4xf32> to vector<1x4x1xf32>
    %28 = arith.addf %23, %27 : vector<1x4x1xf32>
    %c0_12 = arith.constant 0 : index
    %c0_13 = arith.constant 0 : index
    %c0_14 = arith.constant 0 : index
    %29 = vector.load %arg4[%c0_12, %c0_13, %c0_14] : memref<1x4x1xf32, #tpu.memory_space<vmem>>, vector<1x4x1xf32>
    tpu.vector_store %arg4[%c0_12, %c0_13, %c0_14], %28 {strides = array<i32>} : memref<1x4x1xf32, #tpu.memory_space<vmem>>, vector<1x4x1xf32>,
    %c0_15 = arith.constant 0 : index
    %c0_16 = arith.constant 0 : index
    %c0_17 = arith.constant 0 : index
    %30 = vector.load %arg5[%c0_15, %c0_16, %c0_17] : memref<1x4x1xf32, #tpu.memory_space<vmem>>, vector<1x4x1xf32>
    %cst_18 = arith.constant dense<0.000000e+00> : vector<1x4xf32>
    %31 = vector.multi_reduction <add>, %18, %cst_18 [2] : vector<1x4x256xf32> to vector<1x4xf32>
    %32 = vector.shape_cast %31 : vector<1x4xf32> to vector<1x4x1xf32>
    %33 = arith.addf %30, %32 : vector<1x4x1xf32>
    %c0_19 = arith.constant 0 : index
    %c0_20 = arith.constant 0 : index
    %c0_21 = arith.constant 0 : index
    %34 = vector.load %arg5[%c0_19, %c0_20, %c0_21] : memref<1x4x1xf32, #tpu.memory_space<vmem>>, vector<1x4x1xf32>
    tpu.vector_store %arg5[%c0_19, %c0_20, %c0_21], %33 {strides = array<i32>} : memref<1x4x1xf32, #tpu.memory_space<vmem>>, vector<1x4x1xf32>,
    return
  }
  func.func @transform_0(%arg0: i32, %arg1: i32) -> (i32, i32, i32) {
    %c0_i32 = arith.constant 0 : i32
    %c0_i32_0 = arith.constant 0 : i32
    return %arg0, %c0_i32, %arg1 : i32, i32, i32
  }
  func.func @transform_1(%arg0: i32, %arg1: i32) -> (i32, i32, i32) {
    %c0_i32 = arith.constant 0 : i32
    %c0_i32_0 = arith.constant 0 : i32
    return %arg0, %c0_i32, %arg1 : i32, i32, i32
  }
  func.func @transform_2(%arg0: i32, %arg1: i32) -> (i32, i32, i32) {
    %c0_i32 = arith.constant 0 : i32
    %c0_i32_0 = arith.constant 0 : i32
    %c0_i32_1 = arith.constant 0 : i32
    return %arg0, %c0_i32, %c0_i32_0 : i32, i32, i32
  }
  func.func @transform_3(%arg0: i32, %arg1: i32) -> (i32, i32, i32) {
    %c0_i32 = arith.constant 0 : i32
    %c0_i32_0 = arith.constant 0 : i32
    %c0_i32_1 = arith.constant 0 : i32
    return %arg0, %c0_i32, %c0_i32_0 : i32, i32, i32
  }
}

</mosaic_0001>

<bundles_post_ra>
// kernel: tpu_custom_call.1
= control target key start
LH: loop header
LB: loop body
LE: loop exit
PB: predicated region body
PF: predicated region fallthrough
CT: control target
= control target key end

     0   :  { %9 = vsyncpa [#allocation3], 0  ;;  %s934_s0 = inlined_call_operand.hbm [shape: f32[2,4,256], index: 0, kind: input, shape index: {}]   ;;  %s935_s1 = inlined_call_operand.hbm [shape: s32[2,1,256], index: 1, kind: input, shape index: {}]   ;;  %s936_s2 = inlined_call_operand.vmem [shape: f32[2,4,1], index: 2, kind: output, shape index: {0}]   ;;  %s937_s3 = inlined_call_operand.vmem [shape: f32[2,4,1], index: 3, kind: output, shape index: {1}]  }
   0x1   :  { %11 = vsyncpa [#allocation3 + $0x1], 0 }
   0x2   :  { %12 = vsyncpa [#allocation5], 0 }
   0x3   :  { %14 = vsyncpa [#allocation5 + $0x1], 0  ;;  %s735_s12 = smov 0   ;;  %s737_s13 = smov 0  }
   0x4   :  { %s739_s14 = smov 0   ;;  %s741_s15 = smov 0  }
   0x5   :  { %s743_s16 = smov 0   ;;  %s745_s17 = smov 0  }
   0x6 LB: > { %s507_s18 = sadd.s32 4294967295, %s710_s17   ;;  %s32_s19 = sadd.s32 1, %s706_s16  ;;  %s710_s17 = sphi %s745_s17, %s20_s17   ;;  %s706_s16 = sphi %s743_s16, %s951_s16   ;;  %s702_s15 = sphi %s741_s15, %s950_s15   ;;  %s698_s14 = sphi %s739_s14, %s949_s14   ;;  %s694_s13 = sphi %s737_s13, %s948_s13   ;;  %s690_s12 = sphi %s735_s12, %s947_s12  }
   0x7   : > { %p34_p0 = scmp.ge.s32.totalorder %s32_s19, 2  ;;  %s41_s20 = sadd.s32 1, %s698_s14 }
   0x8   : > { %p48_p1 = scmp.ne.s32.totalorder %s698_s14, %s694_s13  ;;  %p49_p2 = scmp.eq.s32.totalorder %s710_s17, 0 }
   0x9   : > { %s953_s19 = smov (%p34_p0, %s32_s19), 0  ;;  %p54_p4 = scmp.ne.s32.totalorder %s694_s13, %s690_s12 }
   0xa   : > { %p771_p3 = por %p49_p2, %p48_p1  ;;  %s36_s22 = ssub.s32 %s706_s16, %s953_s19 }
   0xb   : > { %p55_p5 = scmp.eq.s32.totalorder %s507_s18, 0  ;;  %p39_p6 = scmp.eq.s32.totalorder %s36_s22, 0 }
   0xc   : > { %p539_p8 = scmp.lt.s32.totalorder %s710_s17, 2  ;;  %s787_s25 = sand.u32 1, %s698_s14  }
   0xd   : > { %p778_p7 = por %p55_p5, %p54_p4  ;;  %s526_s26 = sshll.u32 %s706_s16, 7 }
   0xe   : > { %s784_s24 = scalar_select %p39_p6, %s698_s14, %s41_s20  }
   0xf   : > { %s940_s23 = scalar_select %p778_p7, 1, 0 }
  0x10   : > { %s511_s27 = sshll.u32 %s787_s25, 3  ;;  %s794_s30 = scalar_lea.hbm %s934_s0, %s526_s26 }
  0x11   : > { %s162_s4 = scalar_lea.vmem [#allocation2], %s511_s27  ;;  %p798_p9 = pnand %p539_p8, %p771_p3 }
  0x12   : > { %s172_s5 = sshll.u32 %s162_s4, 4  ;;  %s159_s7 = scalar_lea.sflag [#allocation3], %s787_s25  ;;  %s802_s5 = int_to_ptr.vmem [resolvable:$true] %s172_s5 }
  0x13   : > { %s596_s8 = scalar_lea.hbm %s794_s30, 128  ;;  %p598_p13 = pneg %p798_p9 }
  0x14   : > { %p597_p12 = scmp.ne.s32.totalorder %s794_s30, %s596_s8  ;;  %s601_s11 = scalar_lea.hbm %s934_s0, 256 }
  0x15   : > { %p602_p2 = scmp.lt.u32.totalorder %s794_s30, %s934_s0  ;;  %p603_p3 = scmp.lt.u32.totalorder %s601_s11, %s596_s8 }
  0x16   : > { %p599_p0 = pnand %p598_p13, %p597_p12  ;;  %p605_p5 = scmp.lt.u32.totalorder %s596_s8, %s794_s30 }
  0x17   : > { %p604_p4 = por %p603_p3, %p602_p2 }
  0x18   : > { %p600_p1 = pneg %p599_p0 }
  0x19   : > { %p606_p6 = por %p605_p5, %p604_p4 }
  0x1b   : > { %p607_p8 = pnand %p606_p6, %p600_p1 }
  0x1d   : > { %610 = shalt.err (!%p607_p8)
}
  0x1e   : > { %s611_s20 = scalar_lea.vmem %s802_s5, 128  ;;  %s712_s21 = smov [#allocation2]  }
  0x1f   : > { %p612_p12 = scmp.ne.s32.totalorder %s802_s5, %s611_s20  ;;  %s616_s22 = sshll.u32 %s712_s21, 4  ;;  %s617_s22 = int_to_ptr.vmem [resolvable:$false] %s616_s22 }
  0x20   : > { %s618_s26 = scalar_lea.vmem %s617_s22, 256  ;;  %p619_p11 = scmp.lt.s32.totalorder %s802_s5, %s617_s22 }
  0x21   : > { %p614_p0 = pnand %p612_p12, %p598_p13  ;;  %p620_p2 = scmp.lt.s32.totalorder %s618_s26, %s611_s20 }
  0x23   : > { %p615_p10 = pneg %p614_p0  ;;  %p621_p3 = por %p620_p2, %p619_p11 }
  0x25   : > { %p622_p4 = pnand %p621_p3, %p615_p10 }
  0x27   : > { %625 = shalt.err (!%p622_p4)
}
  0x28   : > { %535 = dma.hbm_to_vmem [thread:$0]  (!%p798_p9), %s794_s30, 128, %s802_s5, %s159_s7  }
  0x29   : > { %p942_p1 = scmp.lt.s32.totalorder %s710_s17, 3  ;;  %p943_p5 = scmp.ge.s32.totalorder %s710_s17, 1 }
  0x2a   : > { %s514_s28 = sshll.u32 %s787_s25, 1  ;;  %s527_s29 = sshll.u32 %s706_s16, 5 }
  0x2b   : > { %p836_p6 = pnand %p943_p5, %p942_p1  ;;  %s845_s9 = scalar_lea.hbm %s935_s1, %s527_s29 }
  0x2c   : > { %s183_s10 = scalar_lea.vmem [#allocation4], %s514_s28  ;;  %s180_s30 = scalar_lea.sflag [#allocation5], %s787_s25 }
  0x2d   : > { %s944_s27 = scalar_select %p836_p6, 1, 0 }
  0x2e   : > { %s193_s11 = sshll.u32 %s183_s10, 4  ;;  %s626_s5 = scalar_lea.hbm %s845_s9, 32  ;;  %s194_s11 = int_to_ptr.vmem [resolvable:$true] %s193_s11 }
  0x2f   : > { %p627_p10 = scmp.ne.s32.totalorder %s845_s9, %s626_s5  ;;  %s631_s18 = scalar_lea.hbm %s935_s1, 64 }
  0x30   : > { %p632_p12 = scmp.lt.u32.totalorder %s845_s9, %s935_s1  ;;  %p633_p0 = scmp.lt.u32.totalorder %s631_s18, %s626_s5 }
  0x31   : > { %p629_p11 = pnand %p627_p10, %p598_p13  ;;  %p635_p3 = scmp.lt.u32.totalorder %s626_s5, %s845_s9 }
  0x32   : > { %p634_p2 = por %p633_p0, %p632_p12 }
  0x33   : > { %p630_p8 = pneg %p629_p11 }
  0x34   : > { %p636_p4 = por %p635_p3, %p634_p2 }
  0x36   : > { %p637_p1 = pnand %p636_p4, %p630_p8 }
  0x38   : > { %640 = shalt.err (!%p637_p1)
}
  0x39   : > { %s641_s25 = scalar_lea.vmem %s194_s11, 32  ;;  %s713_s22 = smov [#allocation4]  }
  0x3a   : > { %p642_p5 = scmp.ne.s32.totalorder %s194_s11, %s641_s25  ;;  %s646_s26 = sshll.u32 %s713_s22, 4  ;;  %s647_s26 = int_to_ptr.vmem [resolvable:$false] %s646_s26 }
  0x3b   : > { %s648_s28 = scalar_lea.vmem %s647_s26, 64  ;;  %p649_p7 = scmp.lt.s32.totalorder %s194_s11, %s647_s26 }
  0x3c   : > { %p644_p10 = pnand %p642_p5, %p598_p13  ;;  %p650_p6 = scmp.lt.s32.totalorder %s648_s28, %s641_s25 }
  0x3e   : > { %p645_p11 = pneg %p644_p10  ;;  %p651_p0 = por %p650_p6, %p649_p7 }
  0x40   : > { %p652_p12 = pnand %p651_p0, %p645_p11 }
  0x42   : > { %655 = shalt.err (!%p652_p12)
}
  0x43   : > { %538 = dma.hbm_to_vmem [thread:$0]  (!%p798_p9), %s845_s9, 32, %s194_s11, %s180_s30  }
  0x44   : > { %p945_p8 = scmp.ne.s32.totalorder %s944_s27, 0 }
  0x45   : > { %s204_s29 = sand.u32 (!%p945_p8), 1, %s694_s13   ;;  %p946_p13 = scmp.ne.s32.totalorder (!%p945_p8), %s940_s23, 0 }
  0x46   : > { %202 = sbr.rel (%p945_p8) target bundleno = 300 (0x12c), region = 28  ;;  %s518_s4 = sshll.u32 (!%p945_p8), %s204_s29, 3 }
  0x47   : > { %s205_s8 = scalar_lea.sflag (!%p945_p8), [#allocation3], %s204_s29  ;;  %s208_s10 = scalar_lea.vmem (!%p945_p8), [#allocation2], %s518_s4 }
  0x4d   : > { %681 = dma.done.wait (%p946_p13), %s205_s8, 128  }
  0x4e   : > { %683 = vsyncadd (%p946_p13), %s205_s8, 4294967168  ;;  %s519_s5 = sshll.u32 %s204_s29, 1  ;;  %s214_s7 = scalar_lea.sflag [#allocation5], %s204_s29 }
  0x4f   : > { %s217_s6 = scalar_lea.vmem [#allocation4], %s519_s5 }
  0x50   : > { %685 = dma.done.wait (%p946_p13), %s214_s7, 32  }
  0x51   : > { %687 = vsyncadd (%p946_p13), %s214_s7, 4294967264  ;;  %p250_p7 = scmp.lt.s32.totalorder %s702_s15, 1  ;;  %vm262_vm0 = vcmask 3072   ;;  %vm270_vm1 = vcmask 1043456   ;;  %v714_v0 = vmov 0.0   ;;  %v265_v1 = vld [vmem:[%s208_s10] sm:$0xff]  ;;  %v315_v5 = vlaneseq }
  0x52   : > { %v268_v2 = vcombine.high %v265_v1, %v265_v1  ;;  %v271_v3 = vsel %vm270_vm1, %v265_v1, -inf  ;;  %v266_v18 = vld [vmem:[%s217_s6] sm:$0x3] }
  0x53   : > { %s955_s15 = smov (!%p250_p7, %s702_s15), 1  ;;  %v272_v4 = vrot.slane %v271_v3, 4  ;;  %v316_v11 = vshrl.u32 %v315_v5, 7 }
  0x54   : > { %s520_s27 = sshll.u32 %s955_s15, 2  ;;  %v278_v6 = vsel %vm270_vm1, %v268_v2, -inf }
  0x55   : > { %s888_s30 = scalar_lea.vmem %s936_s2, %s520_s27  ;;  %v273_v7 = vmax.f32 %v271_v3, %v272_v4  ;;  %v279_v8 = vrot.slane %v278_v6, 4  ;;  %v319_v16 = vsub.s32 0, %v316_v11  ;;  %v323_v17 = vsub.s32 1, %v316_v11  ;;  %s257_s18 = scalar_lea.vmem %s937_s3, %s520_s27 }
  0x56   : > { %263 = vst.msk [vmem:[%s888_s30] sm:$0xf] %vm262_vm0, %v714_v0  ;;  %264 = vst.msk [vmem:[%s257_s18] sm:$0xf] %vm262_vm0, %v714_v0 }
  0x57   : > { %v274_v9 = vrot.slane %v273_v7, 2  ;;  %v280_v10 = vmax.f32 %v278_v6, %v279_v8  ;;  %v320_v22 = vrot.slane %v266_v18, %v319_v16  ;;  %v324_v23 = vrot.slane %v266_v18, %v323_v17 }
  0x59   : > { %v275_v12 = vmax.f32 %v273_v7, %v274_v9  ;;  %v281_v13 = vrot.slane %v280_v10, 2  ;;  %vm325_vm2 = vcmp.eq.s32.totalorder %v316_v11, %v320_v22  ;;  %vm326_vm3 = vcmp.eq.s32.totalorder %v316_v11, %v324_v23 }
  0x5a   : > { %v522_v27 = vsel %vm325_vm2, 1.0, %v714_v0  ;;  %v523_v28 = vsel %vm326_vm3, 1.0, %v714_v0 }
  0x5b   : > { %v276_v14 = vrot.slane %v275_v12, 1  ;;  %v282_v15 = vmax.f32 %v280_v10, %v281_v13  ;;  %v333_v29 = vcombine.low %v522_v27, %v523_v28  ;;  %v367_v11 = vsel %vm270_vm1, %v522_v27, 0.0 }
  0x5d   : > { %v277_v19 = vmax.f32 %v275_v12, %v276_v14  ;;  %v283_v20 = vrot.slane %v282_v15, 1  ;;  %v335_v30 = vmul.f32 %v333_v29, %v265_v1  ;;  %v368_v12 = vsel %vm270_vm1, %v523_v28, 0.0  ;;  %v366_v18 = vld [vmem:[%s257_s18] sm:$0xf] }
  0x5e   : > { %v369_v14 = vadd.f32 %v368_v12, %v367_v11 }
  0x5f   : > { %v284_v21 = vmax.f32 %v282_v15, %v283_v20  ;;  %v337_v32 = vcombine.high %v335_v30, %v335_v30  ;;  %v339_v36 = vsel %vm270_vm1, %v335_v30, 0.0  ;;  %v355_v15 = vld [vmem:[%s888_s30] sm:$0xf] }
  0x60   : > { %v340_v41 = vrot.slane %v339_v36, 4 }
  0x61   : > { %v287_v24 = vcombine.low %v277_v19, %v284_v21  ;;  %v346_v40 = vsel %vm270_vm1, %v337_v32, 0.0 }
  0x62   : > { %v347_v44 = vrot.slane %v346_v40, 4  ;;  %v341_v47 = vadd.f32 %v340_v41, %v339_v36 }
  0x63   : > { %v289_v25 = vsub.f32 %v265_v1, %v287_v24 }
  0x64   : > { %v348_v50 = vadd.f32 %v347_v44, %v346_v40  ;;  %v342_v53 = vrot.slane %v341_v47, 2 }
  0x65   : > { %v290_v26 = vmul.f32 1.442695, %v289_v25 }
  0x66   : > { %v349_v55 = vrot.slane %v348_v50, 2  ;;  %v343_v56 = vadd.f32 %v342_v53, %v341_v47 }
  0x67   : > { %590 = vpow2.f32 %v290_v26 }
  0x68   : > { %v350_v57 = vadd.f32 %v349_v55, %v348_v50  ;;  %v344_v58 = vrot.slane %v343_v56, 1 }
  0x6a   : > { %v351_v59 = vrot.slane %v350_v57, 1  ;;  %v345_v62 = vadd.f32 %v344_v58, %v343_v56 }
  0x6c   : > { %v352_v3 = vadd.f32 %v351_v59, %v350_v57 }
  0x71   : > { %v591_v31 = vpop.eup %590 }
  0x72   : > { %v293_v33 = vcombine.high %v591_v31, %v591_v31  ;;  %v295_v34 = vsel %vm270_vm1, %v591_v31, 0.0 }
  0x73   : > { %v296_v35 = vrot.slane %v295_v34, 4 }
  0x74   : > { %v302_v37 = vsel %vm270_vm1, %v293_v33, 0.0 }
  0x75   : > { %v297_v38 = vadd.f32 %v296_v35, %v295_v34  ;;  %v303_v39 = vrot.slane %v302_v37, 4 }
  0x77   : > { %v298_v42 = vrot.slane %v297_v38, 2  ;;  %v304_v43 = vadd.f32 %v303_v39, %v302_v37 }
  0x79   : > { %v299_v45 = vadd.f32 %v298_v42, %v297_v38  ;;  %v305_v46 = vrot.slane %v304_v43, 2 }
  0x7b   : > { %v300_v48 = vrot.slane %v299_v45, 1  ;;  %v306_v49 = vadd.f32 %v305_v46, %v304_v43 }
  0x7d   : > { %v301_v51 = vadd.f32 %v300_v48, %v299_v45  ;;  %v307_v52 = vrot.slane %v306_v49, 1 }
  0x7f   : > { %v308_v54 = vadd.f32 %v307_v52, %v306_v49  ;;  %592 = vlog2.f32 %v301_v51 }
  0x81   : > { %594 = vlog2.f32 %v308_v54 }
  0x89   : > { %v593_v60 = vpop.eup %592 }
  0x8a   : > { %v310_v61 = vmul.f32 0.6931472, %v593_v60 }
  0x8b   : > { %v595_v63 = vpop.eup %594 }
  0x8c   : > { %v312_v1 = vmul.f32 0.6931472, %v595_v63  ;;  %v313_v2 = vadd.f32 %v310_v61, %v277_v19 }
  0x8e   : > { %v314_v4 = vadd.f32 %v312_v1, %v284_v21  ;;  %v353_v5 = vsub.f32 %v313_v2, %v345_v62 }
  0x90   : > { %v354_v6 = vsub.f32 %v314_v4, %v352_v3  ;;  %v356_v7 = vmul.f32 %v522_v27, %v353_v5 }
  0x92   : > { %v357_v8 = vmul.f32 %v523_v28, %v354_v6  ;;  %v358_v9 = vsel %vm270_vm1, %v356_v7, 0.0 }
  0x94   : > { %v359_v10 = vsel %vm270_vm1, %v357_v8, 0.0 }
  0x95   : > { %v360_v13 = vadd.f32 %v359_v10, %v358_v9 }
  0x97   : > { %361 = vadd.xlane.f32.xlu0 %v360_v13 }
  0x9b   : > { %370 = vadd.xlane.f32.xlu0 %v369_v14 }
 0x124   : > { %v362_v16 = vpop.xlane.xlu0 %361 }
 0x125   : > { %v363_v17 = vadd.f32 %v362_v16, %v355_v15 }
 0x127   : > { %365 = vst.msk [vmem:[%s888_s30] sm:$0xf] %vm262_vm0, %v363_v17 }
 0x128   : > { %v371_v19 = vpop.xlane.xlu0 %370 }
 0x129   : > { %v372_v20 = vadd.f32 %v371_v19, %v366_v18 }
 0x12b   : > { %373 = vst.msk [vmem:[%s257_s18] sm:$0xf] %vm262_vm0, %v372_v20 }
 0x12c PF: > { %s20_s17 = sadd.s32 1, %s710_s17   ;;  %s947_s12 = smov %s694_s13 }
 0x12d   : > { %p17_p9 = scmp.ge.s32.totalorder %s20_s17, 4   ;;  %s948_s13 = smov %s698_s14 }
 0x12e   : > { %s949_s14 = smov %s784_s24  ;;  %s950_s15 = smov %s706_s16 }
 0x12f   : > { %s951_s16 = smov %s953_s19  ;;  %19 = sbr.rel (!%p17_p9) target bundleno = 6 (0x6), region = 97 }
 0x136   :  { %407 = vsyncpa [#allocation3], 1 }
 0x137   :  { %409 = vsyncpa [#allocation3 + $0x1], 1 }
 0x138   :  { %410 = vsyncpa [#allocation5], 1 }
 0x139   :  { %412 = vsyncpa [#allocation5 + $0x1], 1 }

</bundles_post_ra>
